<compile_context>
chip_gen: v7x
topology: tpu7x:2x2x1
jax: 0.10.0
libtpu: 0.0.40
codegen_flags: <defaults>
</compile_context>

<pallas_src>
import jax
import jax.numpy as jnp
from jax.experimental import pallas as pl
from jax.experimental.pallas import tpu as pltpu

# Small problem sizes consistent with the module (dim divisible by num_heads).
B = 2          # batch
N = 8          # sequence length (tokens)
C = 32         # embedding dim
NUM_HEADS = 8
HEAD_DIM = C // NUM_HEADS


def _reduce_over_keys(t, op):
    """Reduce a (B, Nq, Mk, H) tensor over the key axis (axis=2), keepdims.

    Implemented as a log2(Mk) tree of static sublane slices + elementwise ops
    (pure VPU work), keeping every op on Mosaic's most mature lowering paths.
    Requires Mk to be a power of two.
    """
    n = t.shape[2]
    while n > 1:
        half = n // 2
        t = op(t[:, :, :half, :], t[:, :, half:n, :])
        n = half
    return t                                    # (B, Nq, 1, H)


def attention_forward(x, w_qkv, w_proj, b_proj, num_heads=NUM_HEADS):
    """x: (B, N, C); w_qkv: (C, 3C); w_proj: (C, C); b_proj: (1, C)."""
    Bb, Nn, Cc = x.shape
    H = num_heads
    hd = Cc // H
    scale = hd ** (-0.5)
    BN = Bb * Nn              # total tokens
    BNN = BN * Nn             # (batch, query, key) triples
    assert Nn & (Nn - 1) == 0, "tree softmax reduction assumes power-of-two N"

    # Trace-time constant selector / replication matrices (tiny f32 arrays):
    #   sel[c, h]        = 1 if channel c belongs to head h            (C, H)
    #   rep[(b,n,m), r]  = 1 if r == b*N + n                           (B*N*N, B*N)
    sel = jnp.repeat(jnp.eye(H, dtype=jnp.float32), hd, axis=0)
    selT = sel.T
    rep = jnp.repeat(jnp.eye(BN, dtype=jnp.float32), Nn, axis=0)
    repT = rep.T

    def kernel(x_ref, wqkv_ref, wproj_ref, bproj_ref,
               sel_ref, selT_ref, rep_ref, repT_ref, o_ref):
        xt = x_ref[...]                                               # (BN, C)

        # Fused qkv projection for all B*N tokens (one MXU matmul).
        qkv = jnp.dot(xt, wqkv_ref[...],
                      preferred_element_type=jnp.float32)             # (BN, 3C)
        q = qkv[:, :Cc] * scale
        k = qkv[:, Cc:2 * Cc]
        v = qkv[:, 2 * Cc:]

        # q_rep[(b,n,m), :] = q[b*N+n, :] — replicate each query row across the
        # key axis with one MXU matmul (no sublane broadcast / relayout needed).
        q_rep = jnp.dot(rep_ref[...], q,
                        preferred_element_type=jnp.float32)           # (BNN, C)
        q_rep = q_rep.reshape(Bb, Nn, Nn, Cc)                         # (B, Nq, Mk, C)
        k_b = k.reshape(Bb, 1, Nn, Cc)                                # bcast over Nq
        v_b = v.reshape(Bb, 1, Nn, Cc)

        # Per-head scaled dot products: q*k reduced over each head's channel
        # group with the constant selector (one MXU matmul for every batch,
        # head and token pair at once).
        prod = q_rep * k_b                                            # (B, Nq, Mk, C)
        s = jnp.dot(prod.reshape(BNN, Cc), sel_ref[...],
                    preferred_element_type=jnp.float32)               # (BNN, H)
        s = s.reshape(Bb, Nn, Nn, H)                                  # (B, Nq, Mk, H)

        # Numerically-stable softmax over the key axis.
        mx = _reduce_over_keys(s, jnp.maximum)                        # (B, Nq, 1, H)
        e = jnp.exp(s - mx)
        den = _reduce_over_keys(e, jnp.add)                           # (B, Nq, 1, H)
        p = e * pl.reciprocal(den, approx=True)                       # (B, Nq, Mk, H)

        # Expand head weights back to channel lanes, weight V, and sum over the
        # key axis — one MXU matmul each.
        p_exp = jnp.dot(p.reshape(BNN, H), selT_ref[...],
                        preferred_element_type=jnp.float32)           # (BNN, C)
        weighted = p_exp.reshape(Bb, Nn, Nn, Cc) * v_b                # (B, Nq, Mk, C)
        attn = jnp.dot(repT_ref[...], weighted.reshape(BNN, Cc),
                       preferred_element_type=jnp.float32)            # (BN, C)

        # Output projection + bias.
        out = jnp.dot(attn, wproj_ref[...],
                      preferred_element_type=jnp.float32) + bproj_ref[...]
        o_ref[...] = out.astype(o_ref.dtype)

    x2d = x.reshape(BN, Cc)   # free layout-preserving reshape in the wrapper

    out2d = pl.pallas_call(
        kernel,
        out_shape=jax.ShapeDtypeStruct((BN, Cc), x.dtype),
        grid_spec=pltpu.PrefetchScalarGridSpec(
            num_scalar_prefetch=0,
            grid=(1,),                     # whole problem in a single step
            in_specs=[
                pl.BlockSpec((BN, Cc), lambda i: (0, 0)),
                pl.BlockSpec((Cc, 3 * Cc), lambda i: (0, 0)),
                pl.BlockSpec((Cc, Cc), lambda i: (0, 0)),
                pl.BlockSpec((1, Cc), lambda i: (0, 0)),
                pl.BlockSpec((Cc, H), lambda i: (0, 0)),
                pl.BlockSpec((H, Cc), lambda i: (0, 0)),
                pl.BlockSpec((BNN, BN), lambda i: (0, 0)),
                pl.BlockSpec((BN, BNN), lambda i: (0, 0)),
            ],
            out_specs=pl.BlockSpec((BN, Cc), lambda i: (0, 0)),
        ),
        compiler_params=pltpu.CompilerParams(
            dimension_semantics=("arbitrary",)),
    )(x2d, w_qkv, w_proj, b_proj, sel, selT, rep, repT)

    return out2d.reshape(Bb, Nn, Cc)


def attention_reference(x, w_qkv, w_proj, b_proj, num_heads=NUM_HEADS):
    """Pure-JAX reference mirroring the PyTorch forward (non-fused path)."""
    Bb, Nn, Cc = x.shape
    hd = Cc // num_heads
    scale = hd ** (-0.5)
    qkv = jnp.einsum("bnc,cd->bnd", x, w_qkv)                        # (B, N, 3C)
    qkv = qkv.reshape(Bb, Nn, 3, num_heads, hd)
    qkv = jnp.transpose(qkv, (2, 0, 3, 1, 4))                        # (3, B, H, N, hd)
    q, k, v = qkv[0], qkv[1], qkv[2]
    q = q * scale
    attn = jnp.einsum("bhqd,bhkd->bhqk", q, k)
    attn = jax.nn.softmax(attn, axis=-1)
    out = jnp.einsum("bhqk,bhkd->bhqd", attn, v)
    out = jnp.transpose(out, (0, 2, 1, 3)).reshape(Bb, Nn, Cc)
    return jnp.einsum("bnc,cd->bnd", out, w_proj) + b_proj[0]


if __name__ == "__main__":
    key = jax.random.PRNGKey(0)
    kx, kq, kp, kb = jax.random.split(key, 4)

    x = jax.random.normal(kx, (B, N, C), dtype=jnp.float32)

    # Deterministic synthetic parameters (Linear weights stored as (in, out)).
    w_qkv = jax.random.normal(kq, (C, 3 * C), dtype=jnp.float32) * (1.0 / C ** 0.5)
    w_proj = jax.random.normal(kp, (C, C), dtype=jnp.float32) * (1.0 / C ** 0.5)
    b_proj = jax.random.normal(kb, (1, C), dtype=jnp.float32) * 0.02

    out = jax.block_until_ready(attention_forward(x, w_qkv, w_proj, b_proj))
    ref = attention_reference(x, w_qkv, w_proj, b_proj)

    assert out.shape == (B, N, C)
    # Tolerance loosened slightly versus exact f32 because the softmax
    # normalization uses the EUP approximate reciprocal (approx=True).
    err = float(jnp.max(jnp.abs(out - ref)))
    assert err < 5e-3, f"mismatch vs reference: max abs err {err}"

    print("KERNEL_OK")
</pallas_src>

<mosaic_0001>
module attributes {stable_mosaic.version = 11 : i64} {
  func.func @kernel(%arg0: i32, %arg1: memref<16x32xf32, #tpu.memory_space<vmem>>, %arg2: memref<32x96xf32, #tpu.memory_space<vmem>>, %arg3: memref<32x32xf32, #tpu.memory_space<vmem>>, %arg4: memref<1x32xf32, #tpu.memory_space<vmem>>, %arg5: memref<32x8xf32, #tpu.memory_space<vmem>>, %arg6: memref<8x32xf32, #tpu.memory_space<vmem>>, %arg7: memref<128x16xf32, #tpu.memory_space<vmem>>, %arg8: memref<16x128xf32, #tpu.memory_space<vmem>>, %arg9: memref<16x32xf32, #tpu.memory_space<vmem>>) attributes {dimension_semantics = [#tpu.dimension_semantics<arbitrary>], iteration_bounds = array<i64: 1>, scalar_prefetch = 0 : i64, scratch_operands = 0 : i64, tpu.core_type = #tpu.core_type<tc>, window_params = [{pipeline_mode = #tpu.pipeline_mode<synchronous>, transform_indices = @transform_0, window_bounds = array<i64: 16, 32>}, {pipeline_mode = #tpu.pipeline_mode<synchronous>, transform_indices = @transform_1, window_bounds = array<i64: 32, 96>}, {pipeline_mode = #tpu.pipeline_mode<synchronous>, transform_indices = @transform_2, window_bounds = array<i64: 32, 32>}, {pipeline_mode = #tpu.pipeline_mode<synchronous>, transform_indices = @transform_3, window_bounds = array<i64: 1, 32>}, {pipeline_mode = #tpu.pipeline_mode<synchronous>, transform_indices = @transform_4, window_bounds = array<i64: 32, 8>}, {pipeline_mode = #tpu.pipeline_mode<synchronous>, transform_indices = @transform_5, window_bounds = array<i64: 8, 32>}, {pipeline_mode = #tpu.pipeline_mode<synchronous>, transform_indices = @transform_6, window_bounds = array<i64: 128, 16>}, {pipeline_mode = #tpu.pipeline_mode<synchronous>, transform_indices = @transform_7, window_bounds = array<i64: 16, 128>}, {pipeline_mode = #tpu.pipeline_mode<synchronous>, transform_indices = @transform_8, window_bounds = array<i64: 16, 32>}]} {
    %c0 = arith.constant 0 : index
    %c0_0 = arith.constant 0 : index
    %0 = vector.load %arg1[%c0, %c0_0] : memref<16x32xf32, #tpu.memory_space<vmem>>, vector<16x32xf32>
    %c0_1 = arith.constant 0 : index
    %c0_2 = arith.constant 0 : index
    %1 = vector.load %arg2[%c0_1, %c0_2] : memref<32x96xf32, #tpu.memory_space<vmem>>, vector<32x96xf32>
    %cst = arith.constant dense<0.000000e+00> : vector<16x96xf32>
    %2 = tpu.matmul %0, %1, %cst {dimension_numbers = #tpu.dot_dimension_numbers<[1], [0], [0], [1], [0, 0, 1, 1], [], []>} : vector<16x32xf32>, vector<32x96xf32>, vector<16x96xf32> -> vector<16x96xf32>
    %3 = vector.extract_strided_slice %2 {offsets = [0, 0], sizes = [16, 32], strides = [1, 1]} : vector<16x96xf32> to vector<16x32xf32>
    %cst_3 = arith.constant 5.000000e-01 : f32
    %4 = vector.broadcast %cst_3 : f32 to vector<16x32xf32>
    %5 = arith.mulf %3, %4 : vector<16x32xf32>
    %6 = vector.extract_strided_slice %2 {offsets = [0, 32], sizes = [16, 32], strides = [1, 1]} : vector<16x96xf32> to vector<16x32xf32>
    %7 = vector.extract_strided_slice %2 {offsets = [0, 64], sizes = [16, 32], strides = [1, 1]} : vector<16x96xf32> to vector<16x32xf32>
    %c0_4 = arith.constant 0 : index
    %c0_5 = arith.constant 0 : index
    %8 = vector.load %arg7[%c0_4, %c0_5] : memref<128x16xf32, #tpu.memory_space<vmem>>, vector<128x16xf32>
    %cst_6 = arith.constant dense<0.000000e+00> : vector<128x32xf32>
    %9 = tpu.matmul %8, %5, %cst_6 {dimension_numbers = #tpu.dot_dimension_numbers<[1], [0], [0], [1], [0, 0, 1, 1], [], []>} : vector<128x16xf32>, vector<16x32xf32>, vector<128x32xf32> -> vector<128x32xf32>
    %10 = vector.shape_cast %9 : vector<128x32xf32> to vector<2x8x8x32xf32>
    %11 = vector.shape_cast %6 : vector<16x32xf32> to vector<2x1x8x32xf32>
    %12 = vector.shape_cast %7 : vector<16x32xf32> to vector<2x1x8x32xf32>
    %13 = vector.broadcast %11 : vector<2x1x8x32xf32> to vector<2x8x8x32xf32>
    %14 = arith.mulf %10, %13 : vector<2x8x8x32xf32>
    %15 = vector.shape_cast %14 : vector<2x8x8x32xf32> to vector<128x32xf32>
    %c0_7 = arith.constant 0 : index
    %c0_8 = arith.constant 0 : index
    %16 = vector.load %arg5[%c0_7, %c0_8] : memref<32x8xf32, #tpu.memory_space<vmem>>, vector<32x8xf32>
    %cst_9 = arith.constant dense<0.000000e+00> : vector<128x8xf32>
    %17 = tpu.matmul %15, %16, %cst_9 {dimension_numbers = #tpu.dot_dimension_numbers<[1], [0], [0], [1], [0, 0, 1, 1], [], []>} : vector<128x32xf32>, vector<32x8xf32>, vector<128x8xf32> -> vector<128x8xf32>
    %18 = vector.shape_cast %17 : vector<128x8xf32> to vector<2x8x8x8xf32>
    %19 = vector.extract_strided_slice %18 {offsets = [0, 0, 0, 0], sizes = [2, 8, 4, 8], strides = [1, 1, 1, 1]} : vector<2x8x8x8xf32> to vector<2x8x4x8xf32>
    %20 = vector.extract_strided_slice %18 {offsets = [0, 0, 4, 0], sizes = [2, 8, 4, 8], strides = [1, 1, 1, 1]} : vector<2x8x8x8xf32> to vector<2x8x4x8xf32>
    %21 = arith.maximumf %19, %20 : vector<2x8x4x8xf32>
    %22 = vector.extract_strided_slice %21 {offsets = [0, 0, 0, 0], sizes = [2, 8, 2, 8], strides = [1, 1, 1, 1]} : vector<2x8x4x8xf32> to vector<2x8x2x8xf32>
    %23 = vector.extract_strided_slice %21 {offsets = [0, 0, 2, 0], sizes = [2, 8, 2, 8], strides = [1, 1, 1, 1]} : vector<2x8x4x8xf32> to vector<2x8x2x8xf32>
    %24 = arith.maximumf %22, %23 : vector<2x8x2x8xf32>
    %25 = vector.extract_strided_slice %24 {offsets = [0, 0, 0, 0], sizes = [2, 8, 1, 8], strides = [1, 1, 1, 1]} : vector<2x8x2x8xf32> to vector<2x8x1x8xf32>
    %26 = vector.extract_strided_slice %24 {offsets = [0, 0, 1, 0], sizes = [2, 8, 1, 8], strides = [1, 1, 1, 1]} : vector<2x8x2x8xf32> to vector<2x8x1x8xf32>
    %27 = arith.maximumf %25, %26 : vector<2x8x1x8xf32>
    %28 = vector.broadcast %27 : vector<2x8x1x8xf32> to vector<2x8x8x8xf32>
    %29 = arith.subf %18, %28 : vector<2x8x8x8xf32>
    %30 = math.exp %29 : vector<2x8x8x8xf32>
    %31 = vector.extract_strided_slice %30 {offsets = [0, 0, 0, 0], sizes = [2, 8, 4, 8], strides = [1, 1, 1, 1]} : vector<2x8x8x8xf32> to vector<2x8x4x8xf32>
    %32 = vector.extract_strided_slice %30 {offsets = [0, 0, 4, 0], sizes = [2, 8, 4, 8], strides = [1, 1, 1, 1]} : vector<2x8x8x8xf32> to vector<2x8x4x8xf32>
    %33 = arith.addf %31, %32 : vector<2x8x4x8xf32>
    %34 = vector.extract_strided_slice %33 {offsets = [0, 0, 0, 0], sizes = [2, 8, 2, 8], strides = [1, 1, 1, 1]} : vector<2x8x4x8xf32> to vector<2x8x2x8xf32>
    %35 = vector.extract_strided_slice %33 {offsets = [0, 0, 2, 0], sizes = [2, 8, 2, 8], strides = [1, 1, 1, 1]} : vector<2x8x4x8xf32> to vector<2x8x2x8xf32>
    %36 = arith.addf %34, %35 : vector<2x8x2x8xf32>
    %37 = vector.extract_strided_slice %36 {offsets = [0, 0, 0, 0], sizes = [2, 8, 1, 8], strides = [1, 1, 1, 1]} : vector<2x8x2x8xf32> to vector<2x8x1x8xf32>
    %38 = vector.extract_strided_slice %36 {offsets = [0, 0, 1, 0], sizes = [2, 8, 1, 8], strides = [1, 1, 1, 1]} : vector<2x8x2x8xf32> to vector<2x8x1x8xf32>
    %39 = arith.addf %37, %38 : vector<2x8x1x8xf32>
    %40 = tpu.reciprocal %39 {approx = true} : vector<2x8x1x8xf32> -> vector<2x8x1x8xf32>
    %41 = vector.broadcast %40 : vector<2x8x1x8xf32> to vector<2x8x8x8xf32>
    %42 = arith.mulf %30, %41 : vector<2x8x8x8xf32>
    %43 = vector.shape_cast %42 : vector<2x8x8x8xf32> to vector<128x8xf32>
    %c0_10 = arith.constant 0 : index
    %c0_11 = arith.constant 0 : index
    %44 = vector.load %arg6[%c0_10, %c0_11] : memref<8x32xf32, #tpu.memory_space<vmem>>, vector<8x32xf32>
    %cst_12 = arith.constant dense<0.000000e+00> : vector<128x32xf32>
    %45 = tpu.matmul %43, %44, %cst_12 {dimension_numbers = #tpu.dot_dimension_numbers<[1], [0], [0], [1], [0, 0, 1, 1], [], []>} : vector<128x8xf32>, vector<8x32xf32>, vector<128x32xf32> -> vector<128x32xf32>
    %46 = vector.shape_cast %45 : vector<128x32xf32> to vector<2x8x8x32xf32>
    %47 = vector.broadcast %12 : vector<2x1x8x32xf32> to vector<2x8x8x32xf32>
    %48 = arith.mulf %46, %47 : vector<2x8x8x32xf32>
    %c0_13 = arith.constant 0 : index
    %c0_14 = arith.constant 0 : index
    %49 = vector.load %arg8[%c0_13, %c0_14] : memref<16x128xf32, #tpu.memory_space<vmem>>, vector<16x128xf32>
    %50 = vector.shape_cast %48 : vector<2x8x8x32xf32> to vector<128x32xf32>
    %cst_15 = arith.constant dense<0.000000e+00> : vector<16x32xf32>
    %51 = tpu.matmul %49, %50, %cst_15 {dimension_numbers = #tpu.dot_dimension_numbers<[1], [0], [0], [1], [0, 0, 1, 1], [], []>} : vector<16x128xf32>, vector<128x32xf32>, vector<16x32xf32> -> vector<16x32xf32>
    %c0_16 = arith.constant 0 : index
    %c0_17 = arith.constant 0 : index
    %52 = vector.load %arg3[%c0_16, %c0_17] : memref<32x32xf32, #tpu.memory_space<vmem>>, vector<32x32xf32>
    %cst_18 = arith.constant dense<0.000000e+00> : vector<16x32xf32>
    %53 = tpu.matmul %51, %52, %cst_18 {dimension_numbers = #tpu.dot_dimension_numbers<[1], [0], [0], [1], [0, 0, 1, 1], [], []>} : vector<16x32xf32>, vector<32x32xf32>, vector<16x32xf32> -> vector<16x32xf32>
    %c0_19 = arith.constant 0 : index
    %c0_20 = arith.constant 0 : index
    %54 = vector.load %arg4[%c0_19, %c0_20] : memref<1x32xf32, #tpu.memory_space<vmem>>, vector<1x32xf32>
    %55 = vector.broadcast %54 : vector<1x32xf32> to vector<16x32xf32>
    %56 = arith.addf %53, %55 : vector<16x32xf32>
    %c0_21 = arith.constant 0 : index
    %c0_22 = arith.constant 0 : index
    %57 = vector.load %arg9[%c0_21, %c0_22] : memref<16x32xf32, #tpu.memory_space<vmem>>, vector<16x32xf32>
    tpu.vector_store %arg9[%c0_21, %c0_22], %56 {strides = array<i32>} : memref<16x32xf32, #tpu.memory_space<vmem>>, vector<16x32xf32>,
    return
  }
  func.func @transform_0(%arg0: i32) -> (i32, i32) {
    %c0_i32 = arith.constant 0 : i32
    %c0_i32_0 = arith.constant 0 : i32
    %c0_i32_1 = arith.constant 0 : i32
    return %c0_i32, %c0_i32_0 : i32, i32
  }
  func.func @transform_1(%arg0: i32) -> (i32, i32) {
    %c0_i32 = arith.constant 0 : i32
    %c0_i32_0 = arith.constant 0 : i32
    %c0_i32_1 = arith.constant 0 : i32
    return %c0_i32, %c0_i32_0 : i32, i32
  }
  func.func @transform_2(%arg0: i32) -> (i32, i32) {
    %c0_i32 = arith.constant 0 : i32
    %c0_i32_0 = arith.constant 0 : i32
    %c0_i32_1 = arith.constant 0 : i32
    return %c0_i32, %c0_i32_0 : i32, i32
  }
  func.func @transform_3(%arg0: i32) -> (i32, i32) {
    %c0_i32 = arith.constant 0 : i32
    %c0_i32_0 = arith.constant 0 : i32
    %c0_i32_1 = arith.constant 0 : i32
    return %c0_i32, %c0_i32_0 : i32, i32
  }
  func.func @transform_4(%arg0: i32) -> (i32, i32) {
    %c0_i32 = arith.constant 0 : i32
    %c0_i32_0 = arith.constant 0 : i32
    %c0_i32_1 = arith.constant 0 : i32
    return %c0_i32, %c0_i32_0 : i32, i32
  }
  func.func @transform_5(%arg0: i32) -> (i32, i32) {
    %c0_i32 = arith.constant 0 : i32
    %c0_i32_0 = arith.constant 0 : i32
    %c0_i32_1 = arith.constant 0 : i32
    return %c0_i32, %c0_i32_0 : i32, i32
  }
  func.func @transform_6(%arg0: i32) -> (i32, i32) {
    %c0_i32 = arith.constant 0 : i32
    %c0_i32_0 = arith.constant 0 : i32
    %c0_i32_1 = arith.constant 0 : i32
    return %c0_i32, %c0_i32_0 : i32, i32
  }
  func.func @transform_7(%arg0: i32) -> (i32, i32) {
    %c0_i32 = arith.constant 0 : i32
    %c0_i32_0 = arith.constant 0 : i32
    %c0_i32_1 = arith.constant 0 : i32
    return %c0_i32, %c0_i32_0 : i32, i32
  }
  func.func @transform_8(%arg0: i32) -> (i32, i32) {
    %c0_i32 = arith.constant 0 : i32
    %c0_i32_0 = arith.constant 0 : i32
    %c0_i32_1 = arith.constant 0 : i32
    return %c0_i32, %c0_i32_0 : i32, i32
  }
}

</mosaic_0001>

<bundles_post_ra>
// kernel: tpu_custom_call.1
= control target key start
LH: loop header
LB: loop body
LE: loop exit
PB: predicated region body
PF: predicated region fallthrough
CT: control target
= control target key end

     0   :  { %vm36_vm0 = vcmask 261120   ;;  %s2363_s0 = inlined_call_operand.vmem [shape: f32[16,32], index: 0, kind: input, shape index: {}]   ;;  %s2364_s1 = inlined_call_operand.vmem [shape: f32[32,96], index: 1, kind: input, shape index: {}]   ;;  %s2365_s2 = inlined_call_operand.vmem [shape: f32[32,32], index: 2, kind: input, shape index: {}]   ;;  %s2366_s3 = inlined_call_operand.vmem [shape: f32[1,32], index: 3, kind: input, shape index: {}]   ;;  %s2367_s4 = inlined_call_operand.vmem [shape: f32[32,8], index: 4, kind: input, shape index: {}]   ;;  %s2368_s5 = inlined_call_operand.vmem [shape: f32[8,32], index: 5, kind: input, shape index: {}]   ;;  %s2369_s6 = inlined_call_operand.vmem [shape: f32[128,16], index: 6, kind: input, shape index: {}]   ;;  %s2370_s7 = inlined_call_operand.vmem [shape: f32[16,128], index: 7, kind: input, shape index: {}]   ;;  %s2371_s8 = inlined_call_operand.hbm [shape: f32[16,32], index: 8, kind: output, shape index: {}]  }
   0x1   :  { %v32_v0 = vld [vmem:[%s2364_s1] sm:$0xff]  ;;  %v33_v1 = vld [vmem:[%s2364_s1 + $0x8] sm:$0xff]  ;;  %v34_v2 = vld [vmem:[%s2364_s1 + $0x10] sm:$0xff] }
   0x2   :  { %v1828_v3 = vpack.c.bf16 %v33_v1, %v32_v0  ;;  %v35_v4 = vld [vmem:[%s2364_s1 + $0x18] sm:$0xff]  ;;  %v30_v5 = vld [vmem:[%s2363_s0] sm:$0xff] }
   0x3   :  { %v1832_v6 = vpack.c.bf16 %v35_v4, %v34_v2  ;;  %1693 = vmatprep.mubr.msk.f32.mxu0 %vm36_vm0, %v30_v5 }
   0x4   :  { %13 = vsyncpa [#allocation3], 0  ;;  %1829 = vmatprep.subr.bf16.mxu0 %v1828_v3  ;;  %v31_v7 = vld [vmem:[%s2363_s0 + $0x8] sm:$0xff]  ;;  %v120_v8 = vld [vmem:[%s2369_s6] sm:$0xff]  ;;  %vm136_vm1 = vcmask 130048   ;;  %s1981_s0 = smov 64  }
   0x5   :  { %1831 = vmatpush3.bf16.msra.mxu0 %v1828_v3  ;;  %1700 = vmatprep.mubr.msk.f32.mxu1 %vm136_vm1, %v120_v8  ;;  %v354_v9 = vld [vmem:[%s2367_s4] sm:$0xff]  ;;  %v355_v10 = vld [vmem:[%s2367_s4 + $0x8] sm:$0xff]  ;;  %s1982_s22 = smov 96   ;;  %v122_v18 = vld [vmem:[%s2369_s6 + $0x10] sm:$0xff]  ;;  %v743_v8 = vlaneseq  ;;  %vm1144_vm2 = vcmask 64512  }
   0x6   :  { %1833 = vmatprep.subr.bf16.mxu0 %v1832_v6  ;;  %v1840_v11 = vpack.c.bf16 %v355_v10, %v354_v9  ;;  %v121_v17 = vld [vmem:[%s2369_s6 + $0x8] sm:$0xff]  ;;  %v123_v19 = vld [vmem:[%s2369_s6 + $0x18] sm:$0xff]  ;;  %v124_v20 = vld [vmem:[%s2369_s6 + $0x20] sm:$0xff] }
   0x7   :  { %v125_v21 = vld [vmem:[%s2369_s6 + $0x28] sm:$0xff]  ;;  %v126_v22 = vld [vmem:[%s2369_s6 + $0x30] sm:$0xff]  ;;  %v127_v23 = vld [vmem:[%s2369_s6 + $0x38] sm:$0xff] }
   0x8   :  { %v128_v24 = vld [vmem:[%s2369_s6 + $0x40] sm:$0xff]  ;;  %v129_v25 = vld [vmem:[%s2369_s6 + $0x48] sm:$0xff]  ;;  %v130_v26 = vld [vmem:[%s2369_s6 + $0x50] sm:$0xff] }
   0x9   :  { %1835 = vmatpush3.bf16.msra.mxu0 %v1832_v6  ;;  %v131_v27 = vld [vmem:[%s2369_s6 + $0x58] sm:$0xff]  ;;  %v132_v28 = vld [vmem:[%s2369_s6 + $0x60] sm:$0xff]  ;;  %v133_v29 = vld [vmem:[%s2369_s6 + $0x68] sm:$0xff] }
   0xa   :  { %1841 = vmatprep.subr.bf16.mxu0 %v1840_v11  ;;  %v134_v30 = vld [vmem:[%s2369_s6 + $0x70] sm:$0xff]  ;;  %v135_v31 = vld [vmem:[%s2369_s6 + $0x78] sm:$0xff]  ;;  %v1143_v5 = vld [vmem:[%s2368_s5] sm:$0xff] }
   0xb   :  { %v356_v32 = vld [vmem:[%s2367_s4 + $0x10] sm:$0xff]  ;;  %v357_v33 = vld [vmem:[%s2367_s4 + $0x18] sm:$0xff] }
   0xc   :  { %1694 = vmatmul.mubr.msk.f32.vlgmr.msra.gmra.mrb[0].mxu0 %vm36_vm0, %v31_v7  ;;  %v1844_v34 = vpack.c.bf16 %v357_v33, %v356_v32 }
   0xd   :  { %1843 = vmatpush3.bf16.msra.mxu0 %v1840_v11 }
   0xe   :  { %1845 = vmatprep.subr.bf16.mxu0 %v1844_v34 }
  0x11   :  { %1847 = vmatpush3.bf16.msra.mxu0 %v1844_v34 }
  0xdf   :  { %v1695_v12 = vpop.f32.mrb[0].mxu0 }
  0xe0   :  { %v109_v13 = vpop.f32.mrb[1].mxu0  ;;  %v119_v14 = vmul.f32 0.5, %v1695_v12 }
  0xe1   :  { %1338 = vrot.lane.b32.xlu1 %v109_v13, %s1981_s0  ;;  %332 = vrot.lane.b32.xlu0 %v109_v13, %s1982_s22  ;;  %v118_v15 = vmul.f32 0.5, %v109_v13 }
  0xe3   :  { %v1836_v16 = vpack.c.bf16 %v119_v14, %v118_v15  ;;  %v744_v15 = vshrl.u32 %v743_v8, 7 }
  0xe5   :  { %1340 = vrot.lane.b32.xlu1 %v1695_v12, %s1981_s0  ;;  %334 = vrot.lane.b32.xlu0 %v1695_v12, %s1982_s22  ;;  %s1983_s0 = smov [#allocation2]  }
  0xe6   :  { %1837 = vmatprep.subr.bf16.mxu1 %v1836_v16  ;;  %s1536_s22 = sshll.u32 %s1983_s0, 4  ;;  %s1537_s22 = int_to_ptr.vmem [resolvable:$true] %s1536_s22 }
  0xe7   :  { %1839 = vmatpush3.bf16.msra.mxu1 %v1836_v16  ;;  %p1962_p1 = scmp.lt.s32.totalorder %s1537_s22, %s1537_s22 }
  0xe8   :  { %1756 = vmatprep.subr.mxu1 %v1143_v5 }
  0xea   :  { %1701 = vmatmul.mubr.msk.f32.vlgmr.msra.gmra.mrb[0].mxu1 %vm136_vm1, %v121_v17 }
  0xeb   :  { %1703 = vmatprep.mubr.msk.f32.mxu1 %vm136_vm1, %v122_v18  ;;  %1757 = vmatpush3.msra.mxu1 %v1143_v5 }
  0xee   :  { %1704 = vmatmul.mubr.msk.f32.gmra.mrb[2].mxu1 %vm136_vm1, %v123_v19 }
  0xef   :  { %1706 = vmatprep.mubr.msk.f32.mxu1 %vm136_vm1, %v124_v20 }
  0xf2   :  { %1707 = vmatmul.mubr.msk.f32.gmra.mrb[4].mxu1 %vm136_vm1, %v125_v21 }
  0xf3   :  { %1709 = vmatprep.mubr.msk.f32.mxu1 %vm136_vm1, %v126_v22 }
  0xf6   :  { %1710 = vmatmul.mubr.msk.f32.gmra.mrb[6].mxu1 %vm136_vm1, %v127_v23 }
  0xf7   :  { %1712 = vmatprep.mubr.msk.f32.mxu1 %vm136_vm1, %v128_v24 }
  0xfa   :  { %1713 = vmatmul.mubr.msk.f32.gmra.mrb[8].mxu1 %vm136_vm1, %v129_v25 }
  0xfb   :  { %1715 = vmatprep.mubr.msk.f32.mxu1 %vm136_vm1, %v130_v26  ;;  %v2146_v26 = vsub.s32 0, %v744_v15 }
  0xfe   :  { %1716 = vmatmul.mubr.msk.f32.gmra.mrb[10].mxu1 %vm136_vm1, %v131_v27 }
  0xff   :  { %1718 = vmatprep.mubr.msk.f32.mxu1 %vm136_vm1, %v132_v28 }
 0x102   :  { %1719 = vmatmul.mubr.msk.f32.gmra.mrb[12].mxu1 %vm136_vm1, %v133_v29 }
 0x103   :  { %1721 = vmatprep.mubr.msk.f32.mxu1 %vm136_vm1, %v134_v30 }
 0x106   :  { %1722 = vmatmul.mubr.msk.f32.gmra.mrb[14].mxu1 %vm136_vm1, %v135_v31 }
 0x153   :  { %v333_v36 = vpop.permute.xlu0 %332 }
 0x157   :  { %v335_v53 = vpop.permute.xlu0 %334 }
 0x1bd   :  { %v1702_v35 = vpop.f32.mrb[0].mxu1 }
 0x1be   :  { %v251_v37 = vpop.f32.mrb[1].mxu1  ;;  %v339_v39 = vmul.f32 %v1702_v35, %v333_v36 }
 0x1bf   :  { %v338_v38 = vmul.f32 %v333_v36, %v251_v37 }
 0x1c1   :  { %v1705_v40 = vpop.f32.mrb[2].mxu1  ;;  %1732 = vmatprep.mubr.msk.f32.mxu0 %vm36_vm0, %v338_v38 }
 0x1c2   :  { %v261_v41 = vpop.f32.mrb[3].mxu1  ;;  %1733 = vmatmul.mubr.msk.f32.vlgmr.msra.gmra.mrb[2].mxu0 %vm36_vm0, %v339_v39  ;;  %v341_v43 = vmul.f32 %v1705_v40, %v333_v36 }
 0x1c3   :  { %v340_v42 = vmul.f32 %v333_v36, %v261_v41 }
 0x1c5   :  { %v1708_v44 = vpop.f32.mrb[4].mxu1  ;;  %1735 = vmatprep.mubr.msk.f32.mxu0 %vm36_vm0, %v340_v42 }
 0x1c6   :  { %v271_v45 = vpop.f32.mrb[5].mxu1  ;;  %1736 = vmatmul.mubr.msk.f32.gmra.mrb[4].mxu0 %vm36_vm0, %v341_v43  ;;  %v343_v47 = vmul.f32 %v1708_v44, %v333_v36 }
 0x1c7   :  { %v342_v46 = vmul.f32 %v333_v36, %v271_v45 }
 0x1c9   :  { %v1711_v48 = vpop.f32.mrb[6].mxu1  ;;  %1738 = vmatprep.mubr.msk.f32.mxu0 %vm36_vm0, %v342_v46 }
 0x1ca   :  { %v281_v49 = vpop.f32.mrb[7].mxu1  ;;  %1739 = vmatmul.mubr.msk.f32.gmra.mrb[6].mxu0 %vm36_vm0, %v343_v47  ;;  %v345_v51 = vmul.f32 %v1711_v48, %v333_v36 }
 0x1cb   :  { %v344_v50 = vmul.f32 %v333_v36, %v281_v49 }
 0x1cd   :  { %v1714_v52 = vpop.f32.mrb[8].mxu1  ;;  %1741 = vmatprep.mubr.msk.f32.mxu0 %vm36_vm0, %v344_v50 }
 0x1ce   :  { %v291_v54 = vpop.f32.mrb[9].mxu1  ;;  %1742 = vmatmul.mubr.msk.f32.gmra.mrb[8].mxu0 %vm36_vm0, %v345_v51  ;;  %v347_v56 = vmul.f32 %v1714_v52, %v335_v53 }
 0x1cf   :  { %v346_v55 = vmul.f32 %v335_v53, %v291_v54 }
 0x1d1   :  { %v1717_v57 = vpop.f32.mrb[10].mxu1  ;;  %1744 = vmatprep.mubr.msk.f32.mxu0 %vm36_vm0, %v346_v55 }
 0x1d2   :  { %v301_v58 = vpop.f32.mrb[11].mxu1  ;;  %1745 = vmatmul.mubr.msk.f32.gmra.mrb[10].mxu0 %vm36_vm0, %v347_v56  ;;  %v349_v60 = vmul.f32 %v1717_v57, %v335_v53 }
 0x1d3   :  { %v348_v59 = vmul.f32 %v335_v53, %v301_v58 }
 0x1d5   :  { %v1720_v61 = vpop.f32.mrb[12].mxu1  ;;  %1747 = vmatprep.mubr.msk.f32.mxu0 %vm36_vm0, %v348_v59 }
 0x1d6   :  { %v311_v62 = vpop.f32.mrb[13].mxu1  ;;  %1748 = vmatmul.mubr.msk.f32.gmra.mrb[12].mxu0 %vm36_vm0, %v349_v60  ;;  %v351_v0 = vmul.f32 %v1720_v61, %v335_v53 }
 0x1d7   :  { %v350_v63 = vmul.f32 %v335_v53, %v311_v62 }
 0x1d9   :  { %v1723_v1 = vpop.f32.mrb[14].mxu1  ;;  %1750 = vmatprep.mubr.msk.f32.mxu0 %vm36_vm0, %v350_v63 }
 0x1da   :  { %v321_v2 = vpop.f32.mrb[15].mxu1  ;;  %1751 = vmatmul.mubr.msk.f32.gmra.mrb[14].mxu0 %vm36_vm0, %v351_v0  ;;  %v353_v4 = vmul.f32 %v1723_v1, %v335_v53 }
 0x1db   :  { %v352_v3 = vmul.f32 %v335_v53, %v321_v2 }
 0x1dd   :  { %1753 = vmatprep.mubr.msk.f32.mxu0 %vm36_vm0, %v352_v3 }
 0x1de   :  { %1754 = vmatmul.mubr.msk.f32.gmra.mrb[16].mxu0 %vm36_vm0, %v353_v4 }
 0x295   :  { %v1734_v6 = vpop.f32.mrb[2].mxu0 }
 0x296   :  { %v568_v7 = vrot.slane %v1734_v6, 4  ;;  %v472_v9 = vpop.f32.mrb[3].mxu0 }
 0x297   :  { %v567_v10 = vrot.slane %v472_v9, 4 }
 0x298   :  { %v600_v11 = vmax.f32 %v1734_v6, %v568_v7 }
 0x299   :  { %v599_v12 = vmax.f32 %v472_v9, %v567_v10  ;;  %v1737_v13 = vpop.f32.mrb[4].mxu0 }
 0x29a   :  { %v632_v14 = vrot.slane %v600_v11, 2  ;;  %v570_v16 = vrot.slane %v1737_v13, 4  ;;  %v482_v17 = vpop.f32.mrb[5].mxu0 }
 0x29b   :  { %v631_v18 = vrot.slane %v599_v12, 2  ;;  %v569_v19 = vrot.slane %v482_v17, 4 }
 0x29c   :  { %v664_v20 = vmax.f32 %v600_v11, %v632_v14  ;;  %v602_v21 = vmax.f32 %v1737_v13, %v570_v16 }
 0x29d   :  { %v663_v22 = vmax.f32 %v599_v12, %v631_v18  ;;  %v601_v23 = vmax.f32 %v482_v17, %v569_v19  ;;  %v1740_v24 = vpop.f32.mrb[6].mxu0 }
 0x29e   :  { %v696_v25 = vrot.slane %v664_v20, 1  ;;  %v634_v27 = vrot.slane %v602_v21, 2  ;;  %v572_v28 = vrot.slane %v1740_v24, 4  ;;  %v492_v29 = vpop.f32.mrb[7].mxu0 }
 0x29f   :  { %v695_v30 = vrot.slane %v663_v22, 1  ;;  %v633_v31 = vrot.slane %v601_v23, 2  ;;  %v571_v32 = vrot.slane %v492_v29, 4 }
 0x2a0   :  { %v728_v33 = vmax.f32 %v664_v20, %v696_v25  ;;  %v666_v34 = vmax.f32 %v602_v21, %v634_v27  ;;  %v604_v35 = vmax.f32 %v1740_v24, %v572_v28 }
 0x2a1   :  { %v727_v36 = vmax.f32 %v663_v22, %v695_v30  ;;  %v665_v37 = vmax.f32 %v601_v23, %v633_v31  ;;  %v603_v38 = vmax.f32 %v492_v29, %v571_v32  ;;  %v2148_v39 = vpop.f32.mrb[8].mxu0 }
 0x2a2   :  { %v750_v40 = vrot.slane %v728_v33, %v2146_v26  ;;  %v698_v41 = vrot.slane %v666_v34, 1  ;;  %v636_v42 = vrot.slane %v604_v35, 2  ;;  %v574_v43 = vrot.slane %v2148_v39, 4  ;;  %v2152_v44 = vpop.f32.mrb[9].mxu0 }
 0x2a3   :  { %v746_v45 = vrot.slane %v727_v36, %v2146_v26  ;;  %v697_v46 = vrot.slane %v665_v37, 1  ;;  %v635_v47 = vrot.slane %v603_v38, 2  ;;  %v573_v48 = vrot.slane %v2152_v44, 4 }
 0x2a4   :  { %v808_v49 = vsub.f32 %v1734_v6, %v750_v40  ;;  %v730_v50 = vmax.f32 %v666_v34, %v698_v41  ;;  %v668_v51 = vmax.f32 %v604_v35, %v636_v42  ;;  %v606_v52 = vmax.f32 %v2148_v39, %v574_v43 }
 0x2a5   :  { %v807_v53 = vsub.f32 %v472_v9, %v746_v45  ;;  %v729_v54 = vmax.f32 %v665_v37, %v697_v46  ;;  %v667_v55 = vmax.f32 %v603_v38, %v635_v47  ;;  %v605_v56 = vmax.f32 %v2152_v44, %v573_v48  ;;  %v2158_v57 = vpop.f32.mrb[10].mxu0 }
 0x2a6   :  { %v825_v58 = vmul.f32 1.442695, %v808_v49  ;;  %v758_v59 = vrot.slane %v730_v50, %v2146_v26  ;;  %v700_v60 = vrot.slane %v668_v51, 1  ;;  %v638_v61 = vrot.slane %v606_v52, 2  ;;  %v2161_v62 = vpop.f32.mrb[11].mxu0 }
 0x2a7   :  { %v823_v63 = vmul.f32 1.442695, %v807_v53  ;;  %v754_v0 = vrot.slane %v729_v54, %v2146_v26  ;;  %v699_v1 = vrot.slane %v667_v55, 1  ;;  %v637_v2 = vrot.slane %v605_v56, 2 }
 0x2a8   :  { %1893 = vpow2.f32 %v825_v58  ;;  %v810_v3 = vsub.f32 %v1737_v13, %v758_v59  ;;  %v732_v4 = vmax.f32 %v668_v51, %v700_v60  ;;  %v670_v5 = vmax.f32 %v606_v52, %v638_v61 }
 0x2a9   :  { %1895 = vpow2.f32 %v823_v63  ;;  %v809_v6 = vsub.f32 %v482_v17, %v754_v0  ;;  %v731_v7 = vmax.f32 %v667_v55, %v699_v1  ;;  %v669_v8 = vmax.f32 %v605_v56, %v637_v2  ;;  %v2164_v9 = vpop.f32.mrb[12].mxu0 }
 0x2aa   :  { %v829_v10 = vmul.f32 1.442695, %v810_v3  ;;  %v766_v11 = vrot.slane %v732_v4, %v2146_v26  ;;  %v702_v12 = vrot.slane %v670_v5, 1  ;;  %v576_v14 = vrot.slane %v2158_v57, 4  ;;  %v2168_v15 = vpop.f32.mrb[13].mxu0 }
 0x2ab   :  { %v827_v16 = vmul.f32 1.442695, %v809_v6  ;;  %v762_v18 = vrot.slane %v731_v7, %v2146_v26  ;;  %v701_v13 = vrot.slane %v669_v8, 1  ;;  %v575_v19 = vrot.slane %v2161_v62, 4 }
 0x2ac   :  { %1897 = vpow2.f32 %v829_v10  ;;  %v812_v17 = vsub.f32 %v1740_v24, %v766_v11  ;;  %v734_v20 = vmax.f32 %v670_v5, %v702_v12  ;;  %v608_v21 = vmax.f32 %v2158_v57, %v576_v14 }
 0x2ad   :  { %1899 = vpow2.f32 %v827_v16  ;;  %v811_v22 = vsub.f32 %v492_v29, %v762_v18  ;;  %v733_v23 = vmax.f32 %v669_v8, %v701_v13  ;;  %v607_v25 = vmax.f32 %v2161_v62, %v575_v19  ;;  %v2174_v27 = vpop.f32.mrb[14].mxu0 }
 0x2ae   :  { %v833_v28 = vmul.f32 1.442695, %v812_v17  ;;  %v774_v30 = vrot.slane %v734_v20, %v2146_v26  ;;  %v640_v31 = vrot.slane %v608_v21, 2  ;;  %v578_v32 = vrot.slane %v2164_v9, 4  ;;  %v2178_v33 = vpop.f32.mrb[15].mxu0 }
 0x2af   :  { %v831_v34 = vmul.f32 1.442695, %v811_v22  ;;  %v770_v24 = vrot.slane %v733_v23, %v2146_v26  ;;  %v639_v35 = vrot.slane %v607_v25, 2  ;;  %v577_v36 = vrot.slane %v2168_v15, 4 }
 0x2b0   :  { %1901 = vpow2.f32 %v833_v28  ;;  %v814_v29 = vsub.f32 %v2148_v39, %v774_v30  ;;  %v672_v37 = vmax.f32 %v608_v21, %v640_v31  ;;  %v610_v38 = vmax.f32 %v2164_v9, %v578_v32 }
 0x2b1   :  { %1903 = vpow2.f32 %v831_v34  ;;  %v813_v40 = vsub.f32 %v2152_v44, %v770_v24  ;;  %v671_v41 = vmax.f32 %v607_v25, %v639_v35  ;;  %v609_v42 = vmax.f32 %v2168_v15, %v577_v36  ;;  %v2186_v43 = vpop.f32.mrb[16].mxu0 }
 0x2b2   :  { %v2188_v45 = vpop.eup %1893  ;;  %v837_v46 = vmul.f32 1.442695, %v814_v29  ;;  %v704_v47 = vrot.slane %v672_v37, 1  ;;  %v642_v48 = vrot.slane %v610_v38, 2  ;;  %v580_v49 = vrot.slane %v2174_v27, 4  ;;  %v2191_v50 = vpop.f32.mrb[17].mxu0 }
 0x2b3   :  { %v2193_v39 = vpop.eup %1895  ;;  %v872_v51 = vrot.slane %v2188_v45, 4  ;;  %v835_v52 = vmul.f32 1.442695, %v813_v40  ;;  %v703_v44 = vrot.slane %v671_v41, 1  ;;  %v641_v53 = vrot.slane %v609_v42, 2 }
 0x2b4   :  { %1905 = vpow2.f32 %v837_v46  ;;  %v736_v54 = vmax.f32 %v672_v37, %v704_v47  ;;  %v674_v55 = vmax.f32 %v610_v38, %v642_v48  ;;  %v612_v56 = vmax.f32 %v2174_v27, %v580_v49 }
 0x2b5   :  { %v904_v58 = vadd.f32 %v2188_v45, %v872_v51  ;;  %1907 = vpow2.f32 %v835_v52  ;;  %v735_v59 = vmax.f32 %v671_v41, %v703_v44  ;;  %v673_v60 = vmax.f32 %v609_v42, %v641_v53 }
 0x2b6   :  { %v2198_v61 = vpop.eup %1897  ;;  %v782_v63 = vrot.slane %v736_v54, %v2146_v26  ;;  %v706_v0 = vrot.slane %v674_v55, 1  ;;  %v644_v1 = vrot.slane %v612_v56, 2  ;;  %v579_v2 = vrot.slane %v2178_v33, 4 }
 0x2b7   :  { %v2202_v3 = vpop.eup %1899  ;;  %v936_v4 = vrot.slane %v904_v58, 2  ;;  %v778_v5 = vrot.slane %v735_v59, %v2146_v26  ;;  %v705_v6 = vrot.slane %v673_v60, 1  ;;  %v582_v7 = vrot.slane %v2186_v43, 4 }
 0x2b8   :  { %v816_v8 = vsub.f32 %v2158_v57, %v782_v63  ;;  %v738_v10 = vmax.f32 %v674_v55, %v706_v0  ;;  %v676_v11 = vmax.f32 %v612_v56, %v644_v1  ;;  %v611_v12 = vmax.f32 %v2178_v33, %v579_v2 }
 0x2b9   :  { %v968_v14 = vadd.f32 %v936_v4, %v904_v58  ;;  %v815_v16 = vsub.f32 %v2161_v62, %v778_v5  ;;  %v737_v18 = vmax.f32 %v673_v60, %v705_v6  ;;  %v614_v13 = vmax.f32 %v2186_v43, %v582_v7 }
 0x2ba   :  { %v2210_v19 = vpop.eup %1901  ;;  %v841_v17 = vmul.f32 1.442695, %v816_v8  ;;  %v790_v20 = vrot.slane %v738_v10, %v2146_v26  ;;  %v708_v21 = vrot.slane %v676_v11, 1  ;;  %v643_v22 = vrot.slane %v611_v12, 2 }
 0x2bb   :  { %v2213_v23 = vpop.eup %1903  ;;  %v839_v57 = vmul.f32 1.442695, %v815_v16  ;;  %v786_v25 = vrot.slane %v737_v18, %v2146_v26  ;;  %v646_v28 = vrot.slane %v614_v13, 2  ;;  %v581_v30 = vrot.slane %v2191_v50, 4 }
 0x2bc   :  { %1909 = vpow2.f32 %v841_v17  ;;  %v818_v62 = vsub.f32 %v2164_v9, %v790_v20  ;;  %v740_v31 = vmax.f32 %v676_v11, %v708_v21  ;;  %v675_v32 = vmax.f32 %v611_v12, %v643_v22 }
 0x2bd   :  { %1911 = vpow2.f32 %v839_v57  ;;  %v817_v34 = vsub.f32 %v2168_v15, %v786_v25  ;;  %v678_v24 = vmax.f32 %v614_v13, %v646_v28  ;;  %v613_v35 = vmax.f32 %v2191_v50, %v581_v30 }
 0x2be   :  { %v2220_v36 = vpop.eup %1905  ;;  %v845_v29 = vmul.f32 1.442695, %v818_v62  ;;  %v798_v37 = vrot.slane %v740_v31, %v2146_v26  ;;  %v707_v38 = vrot.slane %v675_v32, 1  ;;  %v871_v40 = vrot.slane %v2193_v39, 4 }
 0x2bf   :  { %v2224_v41 = vpop.eup %1907  ;;  %v843_v42 = vmul.f32 1.442695, %v817_v34  ;;  %v710_v9 = vrot.slane %v678_v24, 1  ;;  %v645_v46 = vrot.slane %v613_v35, 2  ;;  %v1000_v47 = vrot.slane %v968_v14, 1 }
 0x2c0   :  { %1913 = vpow2.f32 %v845_v29  ;;  %v820_v15 = vsub.f32 %v2174_v27, %v798_v37  ;;  %v739_v48 = vmax.f32 %v675_v32, %v707_v38  ;;  %v903_v49 = vadd.f32 %v2193_v39, %v871_v40 }
 0x2c1   :  { %1915 = vpow2.f32 %v843_v42  ;;  %v742_v51 = vmax.f32 %v678_v24, %v710_v9  ;;  %v677_v52 = vmax.f32 %v613_v35, %v645_v46  ;;  %v1032_v44 = vadd.f32 %v1000_v47, %v968_v14 }
 0x2c2   :  { %v849_v53 = vmul.f32 1.442695, %v820_v15  ;;  %v794_v54 = vrot.slane %v739_v48, %v2146_v26  ;;  %v935_v55 = vrot.slane %v903_v49, 2  ;;  %v873_v56 = vrot.slane %v2202_v3, 4 }
 0x2c3   :  { %v806_v58 = vrot.slane %v742_v51, %v2146_v26  ;;  %v709_v59 = vrot.slane %v677_v52, 1  ;;  %1917 = vrcp.f32 %v1032_v44  ;;  %v874_v60 = vrot.slane %v2198_v61, 4 }
 0x2c4   :  { %1919 = vpow2.f32 %v849_v53  ;;  %v819_v27 = vsub.f32 %v2178_v33, %v794_v54  ;;  %v967_v63 = vadd.f32 %v935_v55, %v903_v49  ;;  %v905_v0 = vadd.f32 %v2202_v3, %v873_v56 }
 0x2c5   :  { %v822_v1 = vsub.f32 %v2186_v43, %v806_v58  ;;  %v741_v2 = vmax.f32 %v677_v52, %v709_v59  ;;  %v906_v4 = vadd.f32 %v2198_v61, %v874_v60  ;;  %v875_v5 = vrot.slane %v2213_v23, 4 }
 0x2c6   :  { %v2237_v6 = vpop.eup %1909  ;;  %v847_v7 = vmul.f32 1.442695, %v819_v27  ;;  %v999_v8 = vrot.slane %v967_v63, 1  ;;  %v937_v10 = vrot.slane %v905_v0, 2  ;;  %v876_v11 = vrot.slane %v2210_v19, 4 }
 0x2c7   :  { %v2240_v12 = vpop.eup %1911  ;;  %v853_v33 = vmul.f32 1.442695, %v822_v1  ;;  %v802_v14 = vrot.slane %v741_v2, %v2146_v26  ;;  %v938_v16 = vrot.slane %v906_v4, 2  ;;  %v907_v43 = vadd.f32 %v2213_v23, %v875_v5 }
 0x2c8   :  { %1921 = vpow2.f32 %v847_v7  ;;  %v1031_v18 = vadd.f32 %v999_v8, %v967_v63  ;;  %v969_v13 = vadd.f32 %v937_v10, %v905_v0  ;;  %v908_v17 = vadd.f32 %v2210_v19, %v876_v11 }
 0x2c9   :  { %1923 = vpow2.f32 %v853_v33  ;;  %v821_v20 = vsub.f32 %v2191_v50, %v802_v14  ;;  %v970_v21 = vadd.f32 %v938_v16, %v906_v4  ;;  %v939_v22 = vrot.slane %v907_v43, 2 }
 0x2ca   :  { %v2246_v57 = vpop.eup %1913  ;;  %1925 = vrcp.f32 %v1031_v18  ;;  %v1001_v25 = vrot.slane %v969_v13, 1  ;;  %v940_v28 = vrot.slane %v908_v17, 2  ;;  %v877_v30 = vrot.slane %v2224_v41, 4 }
 0x2cb   :  { %v2249_v62 = vpop.eup %1915  ;;  %v851_v31 = vmul.f32 1.442695, %v821_v20  ;;  %v1002_v32 = vrot.slane %v970_v21, 1  ;;  %v971_v34 = vadd.f32 %v939_v22, %v907_v43  ;;  %v878_v24 = vrot.slane %v2220_v36, 4 }
 0x2cc   :  { %v1033_v35 = vadd.f32 %v1001_v25, %v969_v13  ;;  %v972_v29 = vadd.f32 %v940_v28, %v908_v17  ;;  %v909_v50 = vadd.f32 %v2224_v41, %v877_v30  ;;  %v879_v37 = vrot.slane %v2240_v12, 4 }
 0x2cd   :  { %v1918_v38 = vpop.eup %1917  ;;  %1927 = vpow2.f32 %v851_v31  ;;  %v1034_v40 = vadd.f32 %v1002_v32, %v970_v21  ;;  %v1003_v42 = vrot.slane %v971_v34, 1  ;;  %v910_v9 = vadd.f32 %v2220_v36, %v878_v24 }
 0x2ce   :  { %v2255_v46 = vpop.eup %1919  ;;  %v1070_v47 = vrot.slane %v1918_v38, %v2146_v26  ;;  %1929 = vrcp.f32 %v1033_v35  ;;  %v1004_v15 = vrot.slane %v972_v29, 1  ;;  %v941_v48 = vrot.slane %v909_v50, 2 }
 0x2cf   :  { %1931 = vrcp.f32 %v1034_v40  ;;  %v1035_v49 = vadd.f32 %v1003_v42, %v971_v34  ;;  %v942_v51 = vrot.slane %v910_v9, 2  ;;  %v911_v52 = vadd.f32 %v2240_v12, %v879_v37 }
 0x2d0   :  { %v1128_v44 = vmul.f32 %v2188_v45, %v1070_v47  ;;  %v1036_v53 = vadd.f32 %v1004_v15, %v972_v29  ;;  %v973_v54 = vadd.f32 %v941_v48, %v909_v50  ;;  %v880_v55 = vrot.slane %v2237_v6, 4 }
 0x2d1   :  { %1933 = vrcp.f32 %v1035_v49  ;;  %v974_v56 = vadd.f32 %v942_v51, %v910_v9  ;;  %v943_v58 = vrot.slane %v911_v52, 2  ;;  %v881_v59 = vrot.slane %v2249_v62, 4 }
 0x2d2   :  { %v2262_v60 = vpop.eup %1921  ;;  %1935 = vrcp.f32 %v1036_v53  ;;  %v1005_v27 = vrot.slane %v973_v54, 1  ;;  %v912_v63 = vadd.f32 %v2237_v6, %v880_v55  ;;  %v882_v0 = vrot.slane %v2246_v57, 4 }
 0x2d3   :  { %v2266_v1 = vpop.eup %1923  ;;  %v1006_v45 = vrot.slane %v974_v56, 1  ;;  %v975_v2 = vadd.f32 %v943_v58, %v911_v52  ;;  %v913_v4 = vadd.f32 %v2249_v62, %v881_v59  ;;  %v883_v5 = vrot.slane %v2262_v60, 4 }
 0x2d4   :  { %v1926_v7 = vpop.eup %1925  ;;  %v1037_v8 = vadd.f32 %v1005_v27, %v973_v54  ;;  %v944_v10 = vrot.slane %v912_v63, 2  ;;  %v914_v11 = vadd.f32 %v2246_v57, %v882_v0  ;;  %v884_v33 = vrot.slane %v2255_v46, 4 }
 0x2d5   :  { %v1066_v14 = vrot.slane %v1926_v7, %v2146_v26  ;;  %v1038_v16 = vadd.f32 %v1006_v45, %v974_v56  ;;  %v1007_v43 = vrot.slane %v975_v2, 1  ;;  %v945_v18 = vrot.slane %v913_v4, 2 }
 0x2d6   :  { %1937 = vrcp.f32 %v1037_v8  ;;  %v976_v13 = vadd.f32 %v944_v10, %v912_v63  ;;  %v946_v17 = vrot.slane %v914_v11, 2  ;;  %v915_v20 = vadd.f32 %v2262_v60, %v883_v5 }
 0x2d7   :  { %v2274_v21 = vpop.eup %1927  ;;  %v1127_v22 = vmul.f32 %v2193_v39, %v1066_v14  ;;  %1939 = vrcp.f32 %v1038_v16  ;;  %v1039_v25 = vadd.f32 %v1007_v43, %v975_v2  ;;  %v977_v28 = vadd.f32 %v945_v18, %v913_v4 }
 0x2d8   :  { %v1930_v30 = vpop.eup %1929  ;;  %v1008_v31 = vrot.slane %v976_v13, 1  ;;  %v978_v32 = vadd.f32 %v946_v17, %v914_v11  ;;  %v947_v34 = vrot.slane %v915_v20, 2  ;;  %v916_v24 = vadd.f32 %v2255_v46, %v884_v33 }
 0x2d9   :  { %v1932_v35 = vpop.eup %1931  ;;  %1758 = vmatprep.mubr.msk.f32.mxu1 %vm1144_vm2, %v1127_v22  ;;  %v1074_v29 = vrot.slane %v1930_v30, %v2146_v26  ;;  %1941 = vrcp.f32 %v1039_v25  ;;  %v1009_v50 = vrot.slane %v977_v28, 1  ;;  %v885_v37 = vrot.slane %v2274_v21, 4 }
 0x2da   :  { %1759 = vmatmul.mubr.msk.f32.vlgmr.msra.gmra.mrb[16].mxu1 %vm1144_vm2, %v1128_v44  ;;  %v1078_v39 = vrot.slane %v1932_v35, %v2146_v26  ;;  %v1040_v38 = vadd.f32 %v1008_v31, %v976_v13  ;;  %v1010_v40 = vrot.slane %v978_v32, 1  ;;  %v979_v42 = vadd.f32 %v947_v34, %v915_v20 }
 0x2db   :  { %v1934_v9 = vpop.eup %1933  ;;  %v1129_v47 = vmul.f32 %v2202_v3, %v1074_v29  ;;  %v1041_v15 = vadd.f32 %v1009_v50, %v977_v28  ;;  %v948_v48 = vrot.slane %v916_v24, 2  ;;  %v917_v49 = vadd.f32 %v2274_v21, %v885_v37 }
 0x2dc   :  { %v1936_v51 = vpop.eup %1935  ;;  %v1130_v52 = vmul.f32 %v2198_v61, %v1078_v39  ;;  %v1082_v53 = vrot.slane %v1934_v9, %v2146_v26  ;;  %1943 = vrcp.f32 %v1040_v38  ;;  %v1042_v54 = vadd.f32 %v1010_v40, %v978_v32  ;;  %v1360_v38 = vld [vmem:[%s2370_s7] sm:$0xff] }
 0x2dd   :  { %1761 = vmatprep.mubr.msk.f32.mxu1 %vm1144_vm2, %v1129_v47  ;;  %v1086_v44 = vrot.slane %v1936_v51, %v2146_v26  ;;  %1945 = vrcp.f32 %v1041_v15  ;;  %v1011_v55 = vrot.slane %v979_v42, 1  ;;  %v980_v56 = vadd.f32 %v948_v48, %v916_v24  ;;  %1814 = vmatprep.mubr.f32.mxu0 %v1360_v38 }
 0x2de   :  { %1762 = vmatmul.mubr.msk.f32.gmra.mrb[18].mxu1 %vm1144_vm2, %v1130_v52  ;;  %v1131_v3 = vmul.f32 %v2213_v23, %v1082_v53  ;;  %1947 = vrcp.f32 %v1042_v54  ;;  %v949_v58 = vrot.slane %v917_v49, 2  ;;  %v886_v59 = vrot.slane %v2266_v1, 4 }
 0x2df   :  { %v1043_v61 = vadd.f32 %v1011_v55, %v979_v42  ;;  %v1012_v27 = vrot.slane %v980_v56, 1  ;;  %v1132_v0 = vmul.f32 %v2210_v19, %v1086_v44 }
 0x2e0   :  { %v1938_v63 = vpop.eup %1937  ;;  %1764 = vmatprep.mubr.msk.f32.mxu1 %vm1144_vm2, %v1131_v3  ;;  %v981_v45 = vadd.f32 %v949_v58, %v917_v49  ;;  %v918_v2 = vadd.f32 %v2266_v1, %v886_v59 }
 0x2e1   :  { %v1940_v4 = vpop.eup %1939  ;;  %v1090_v5 = vrot.slane %v1938_v63, %v2146_v26  ;;  %1949 = vrcp.f32 %v1043_v61  ;;  %v1044_v7 = vadd.f32 %v1012_v27, %v980_v56 }
 0x2e2   :  { %1765 = vmatmul.mubr.msk.f32.gmra.mrb[20].mxu1 %vm1144_vm2, %v1132_v0  ;;  %v1094_v23 = vrot.slane %v1940_v4, %v2146_v26  ;;  %v1013_v8 = vrot.slane %v981_v45, 1  ;;  %v950_v10 = vrot.slane %v918_v2, 2 }
 0x2e3   :  { %v1942_v11 = vpop.eup %1941  ;;  %v1133_v33 = vmul.f32 %v2224_v41, %v1090_v5  ;;  %1951 = vrcp.f32 %v1044_v7 }
 0x2e4   :  { %v1134_v19 = vmul.f32 %v2220_v36, %v1094_v23  ;;  %v1098_v14 = vrot.slane %v1942_v11, %v2146_v26  ;;  %v1045_v16 = vadd.f32 %v1013_v8, %v981_v45  ;;  %v982_v43 = vadd.f32 %v950_v10, %v918_v2 }
 0x2e5   :  { %1767 = vmatprep.mubr.msk.f32.mxu1 %vm1144_vm2, %v1133_v33 }
 0x2e6   :  { %v1944_v18 = vpop.eup %1943  ;;  %1768 = vmatmul.mubr.msk.f32.gmra.mrb[22].mxu1 %vm1144_vm2, %v1134_v19  ;;  %v1135_v13 = vmul.f32 %v2240_v12, %v1098_v14  ;;  %1953 = vrcp.f32 %v1045_v16  ;;  %v1014_v17 = vrot.slane %v982_v43, 1 }
 0x2e7   :  { %v1946_v20 = vpop.eup %1945  ;;  %v1102_v22 = vrot.slane %v1944_v18, %v2146_v26 }
 0x2e8   :  { %v1948_v41 = vpop.eup %1947  ;;  %1770 = vmatprep.mubr.msk.f32.mxu1 %vm1144_vm2, %v1135_v13  ;;  %v1106_v36 = vrot.slane %v1946_v20, %v2146_v26  ;;  %v1046_v25 = vadd.f32 %v1014_v17, %v982_v43  ;;  %v1437_v13 = vld [vmem:[%s2365_s2] sm:$0xff]  ;;  %v1438_v17 = vld [vmem:[%s2365_s2 + $0x8] sm:$0xff] }
 0x2e9   :  { %v1136_v28 = vmul.f32 %v2237_v6, %v1102_v22  ;;  %v1110_v30 = vrot.slane %v1948_v41, %v2146_v26  ;;  %v1880_v41 = vpack.c.bf16 %v1438_v17, %v1437_v13 }
 0x2ea   :  { %v1137_v31 = vmul.f32 %v2249_v62, %v1106_v36  ;;  %1955 = vrcp.f32 %v1046_v25  ;;  %v1439_v36 = vld [vmem:[%s2365_s2 + $0x10] sm:$0xff]  ;;  %v1440_v25 = vld [vmem:[%s2365_s2 + $0x18] sm:$0xff] }
 0x2eb   :  { %v1950_v32 = vpop.eup %1949  ;;  %1771 = vmatmul.mubr.msk.f32.gmra.mrb[24].mxu1 %vm1144_vm2, %v1136_v28  ;;  %v1138_v24 = vmul.f32 %v2246_v57, %v1110_v30  ;;  %v1361_v28 = vld [vmem:[%s2370_s7 + $0x8] sm:$0xff]  ;;  %v1884_v30 = vpack.c.bf16 %v1440_v25, %v1439_v36  ;;  %s1957_s7 = scalar_lea.vmem %s1537_s22, 256 }
 0x2ec   :  { %1773 = vmatprep.mubr.msk.f32.mxu1 %vm1144_vm2, %v1137_v31  ;;  %v1114_v12 = vrot.slane %v1950_v32, %v2146_v26  ;;  %p1958_p0 = scmp.ne.s32.totalorder %s1537_s22, %s1957_s7  ;;  %p1963_p2 = scmp.lt.s32.totalorder %s1957_s7, %s1957_s7 }
 0x2ed   :  { %v1952_v34 = vpop.eup %1951 }
 0x2ee   :  { %v1139_v35 = vmul.f32 %v2262_v60, %v1114_v12  ;;  %v1118_v29 = vrot.slane %v1952_v34, %v2146_v26  ;;  %v1597_v12 = vld [vmem:[%s2366_s3] ss:$0 sm:$0xff]  ;;  %p1964_p3 = por %p1963_p2, %p1962_p1 }
 0x2ef   :  { %1774 = vmatmul.mubr.msk.f32.gmra.mrb[26].mxu1 %vm1144_vm2, %v1138_v24 }
 0x2f0   :  { %v1954_v6 = vpop.eup %1953  ;;  %1776 = vmatprep.mubr.msk.f32.mxu1 %vm1144_vm2, %v1139_v35  ;;  %v1140_v62 = vmul.f32 %v2255_v46, %v1118_v29  ;;  %v1339_v46 = vpop.permute.xlu1 %1338  ;;  %p1965_p4 = pnand %p1964_p3, %p1958_p0 }
 0x2f1   :  { %v1122_v50 = vrot.slane %v1954_v6, %v2146_v26 }
 0x2f3   :  { %1777 = vmatmul.mubr.msk.f32.gmra.mrb[28].mxu1 %vm1144_vm2, %v1140_v62  ;;  %v1141_v37 = vmul.f32 %v2274_v21, %v1122_v50 }
 0x2f4   :  { %v1956_v39 = vpop.eup %1955  ;;  %v1341_v61 = vpop.permute.xlu1 %1340 }
 0x2f5   :  { %1779 = vmatprep.mubr.msk.f32.mxu1 %vm1144_vm2, %v1141_v37  ;;  %v1126_v57 = vrot.slane %v1956_v39, %v2146_v26 }
 0x2f7   :  { %v1142_v60 = vmul.f32 %v2266_v1, %v1126_v57 }
 0x2f9   :  { %1780 = vmatmul.mubr.msk.f32.gmra.mrb[30].mxu1 %vm1144_vm2, %v1142_v60 }
 0x3ad   :  { %v1760_v40 = vpop.f32.mrb[16].mxu1 }
 0x3ae   :  { %v1345_v42 = vmul.f32 %v1760_v40, %v1339_v46  ;;  %v1259_v9 = vpop.f32.mrb[17].mxu1 }
 0x3af   :  { %v1344_v47 = vmul.f32 %v1339_v46, %v1259_v9 }
 0x3b1   :  { %v1848_v21 = vpack.c.bf16 %v1345_v42, %v1344_v47  ;;  %v1763_v15 = vpop.f32.mrb[18].mxu1 }
 0x3b2   :  { %v1347_v48 = vmul.f32 %v1763_v15, %v1339_v46  ;;  %v1269_v49 = vpop.f32.mrb[19].mxu1 }
 0x3b3   :  { %v1346_v51 = vmul.f32 %v1339_v46, %v1269_v49  ;;  %1849 = vmatprep.subr.bf16.mxu0 %v1848_v21 }
 0x3b4   :  { %1851 = vmatpush3.bf16.msra.mxu0 %v1848_v21 }
 0x3b5   :  { %v1852_v26 = vpack.c.bf16 %v1347_v48, %v1346_v51  ;;  %v1766_v1 = vpop.f32.mrb[20].mxu1 }
 0x3b6   :  { %v1349_v52 = vmul.f32 %v1766_v1, %v1339_v46  ;;  %v1279_v53 = vpop.f32.mrb[21].mxu1 }
 0x3b7   :  { %v1348_v54 = vmul.f32 %v1339_v46, %v1279_v53  ;;  %1853 = vmatprep.subr.bf16.mxu0 %v1852_v26 }
 0x3b8   :  { %1855 = vmatpush3.bf16.msra.mxu0 %v1852_v26 }
 0x3b9   :  { %v1856_v44 = vpack.c.bf16 %v1349_v52, %v1348_v54  ;;  %v1769_v55 = vpop.f32.mrb[22].mxu1 }
 0x3ba   :  { %v1351_v56 = vmul.f32 %v1769_v55, %v1339_v46  ;;  %v1289_v3 = vpop.f32.mrb[23].mxu1 }
 0x3bb   :  { %v1350_v58 = vmul.f32 %v1339_v46, %v1289_v3  ;;  %1857 = vmatprep.subr.bf16.mxu0 %v1856_v44 }
 0x3bc   :  { %1859 = vmatpush3.bf16.msra.mxu0 %v1856_v44 }
 0x3bd   :  { %v1860_v59 = vpack.c.bf16 %v1351_v56, %v1350_v58 }
 0x3be   :  { %v1772_v27 = vpop.f32.mrb[24].mxu1 }
 0x3bf   :  { %v1353_v63 = vmul.f32 %v1772_v27, %v1341_v61  ;;  %v1299_v0 = vpop.f32.mrb[25].mxu1  ;;  %1861 = vmatprep.subr.bf16.mxu0 %v1860_v59 }
 0x3c0   :  { %v1352_v45 = vmul.f32 %v1341_v61, %v1299_v0  ;;  %1863 = vmatpush3.bf16.msra.mxu0 %v1860_v59 }
 0x3c2   :  { %v1864_v2 = vpack.c.bf16 %v1353_v63, %v1352_v45  ;;  %v1775_v4 = vpop.f32.mrb[26].mxu1 }
 0x3c3   :  { %v1355_v5 = vmul.f32 %v1775_v4, %v1341_v61  ;;  %v1309_v7 = vpop.f32.mrb[27].mxu1 }
 0x3c4   :  { %v1354_v23 = vmul.f32 %v1341_v61, %v1309_v7  ;;  %1865 = vmatprep.subr.bf16.mxu0 %v1864_v2 }
 0x3c5   :  { %1867 = vmatpush3.bf16.msra.mxu0 %v1864_v2 }
 0x3c6   :  { %v1868_v8 = vpack.c.bf16 %v1355_v5, %v1354_v23  ;;  %v1778_v10 = vpop.f32.mrb[28].mxu1 }
 0x3c7   :  { %v1357_v11 = vmul.f32 %v1778_v10, %v1341_v61  ;;  %v1319_v33 = vpop.f32.mrb[29].mxu1 }
 0x3c8   :  { %v1356_v19 = vmul.f32 %v1341_v61, %v1319_v33  ;;  %1869 = vmatprep.subr.bf16.mxu0 %v1868_v8 }
 0x3c9   :  { %1871 = vmatpush3.bf16.msra.mxu0 %v1868_v8 }
 0x3ca   :  { %v1872_v14 = vpack.c.bf16 %v1357_v11, %v1356_v19 }
 0x3cc   :  { %v1781_v16 = vpop.f32.mrb[30].mxu1  ;;  %1873 = vmatprep.subr.bf16.mxu0 %v1872_v14 }
 0x3cd   :  { %v1359_v43 = vmul.f32 %v1781_v16, %v1341_v61  ;;  %v1329_v18 = vpop.f32.mrb[31].mxu1  ;;  %1875 = vmatpush3.bf16.msra.mxu0 %v1872_v14 }
 0x3ce   :  { %v1358_v20 = vmul.f32 %v1341_v61, %v1329_v18 }
 0x3d0   :  { %v1876_v22 = vpack.c.bf16 %v1359_v43, %v1358_v20 }
 0x3d2   :  { %1877 = vmatprep.subr.bf16.mxu0 %v1876_v22 }
 0x3d3   :  { %1879 = vmatpush3.bf16.msra.mxu0 %v1876_v22 }
 0x3d4   :  { %1881 = vmatprep.subr.bf16.mxu0 %v1880_v41 }
 0x3d6   :  { %1815 = vmatmul.mubr.f32.vlgmr.msra.gmra.mrb[18].mxu0 %v1361_v28 }
 0x3d7   :  { %1883 = vmatpush3.bf16.msra.mxu0 %v1880_v41 }
 0x3d8   :  { %1885 = vmatprep.subr.bf16.mxu0 %v1884_v30 }
 0x3db   :  { %1887 = vmatpush3.bf16.msra.mxu0 %v1884_v30 }
 0x4a9   :  { %v1816_v31 = vpop.f32.mrb[18].mxu0 }
 0x4aa   :  { %v1428_v32 = vpop.f32.mrb[19].mxu0 }
 0x4ab   :  { %1825 = vmatprep.mubr.msk.f32.mxu0 %vm36_vm0, %v1428_v32 }
 0x4ac   :  { %1826 = vmatmul.mubr.msk.f32.vlgmr.msra.gmra.mrb[20].mxu0 %vm36_vm0, %v1816_v31 }
 0x57f   :  { %v1827_v34 = vpop.f32.mrb[20].mxu0 }
 0x580   :  { %v1526_v24 = vadd.f32 %v1827_v34, %v1597_v12  ;;  %v1520_v35 = vpop.f32.mrb[21].mxu0 }
 0x581   :  { %v1521_v29 = vadd.f32 %v1597_v12, %v1520_v35 }
 0x582   :  { %1530 = vst.msk [vmem:[#allocation2 + $0x8] sm:$0xff] %vm36_vm0, %v1526_v24 }
 0x583   :  { %1529 = vst.msk [vmem:[#allocation2] sm:$0xff] %vm36_vm0, %v1521_v29 }
 0x584   :  { %1968 = shalt.err (!%p1965_p4)
}
 0x585   :  { %s1969_s24 = scalar_lea.hbm %s2371_s8, 256 }
 0x586   :  { %p1970_p5 = scmp.ne.s32.totalorder %s2371_s8, %s1969_s24  ;;  %p1973_p6 = scmp.lt.u32.totalorder %s1969_s24, %s2371_s8 }
 0x588   :  { %p1975_p7 = pnand %p1973_p6, %p1970_p5 }
 0x58a   :  { %1978 = shalt.err (!%p1975_p7)
}
 0x58b   :  { %s1984_s29 = smov 128   ;;  %s1985_s30 = smov 8  }
 0x58c   :  { %1542 = dma.vmem_to_hbm [thread:$0]  %s1537_s22, 256, %s2371_s8, [#allocation3], %s1984_s29, %s1984_s29, %s1985_s30  }
 0x58d   :  { %1979 = dma.done.wait [#allocation3], 256  }
 0x58e   :  { %1980 = vsyncadd [#allocation3], 4294967040 }
 0x58f   :  { %1546 = vsyncpa [#allocation3], 1 }

</bundles_post_ra>
